<compile_context>
chip_gen: v6e
topology: v6e:2x2x1
jax: 0.10.0
libtpu: 0.0.40
codegen_flags: <defaults>
</compile_context>

<pallas_src>
import jax
import jax.numpy as jnp
from jax.experimental import pallas as pl
from jax.experimental.pallas import tpu as pltpu


def _sdp_like_kernel(x1_ref, x2_ref, sk_ref, o_ref):
    # Each grid point handles one batch element, all heads at once.
    x1 = x1_ref[0]  # (H, S, D)
    x2 = x2_ref[0]  # (H, S, D)
    sk = sk_ref[0]  # (H, S, S), already pre-scaled by scale_factor

    # qk = x1 @ x2^T per head — contract last axes directly (no explicit .T).
    qk = jnp.einsum("hsd,htd->hst", x1, x2,
                    preferred_element_type=jnp.float32)        # (H, S, S)
    v = jnp.einsum("hst,htd->hsd", qk, x2,
                   preferred_element_type=jnp.float32)         # (H, S, D)
    out = jnp.einsum("hst,htd->hsd", sk, v,
                     preferred_element_type=jnp.float32)       # (H, S, D)

    # TODO(synk): torch.nn.Dropout(p=0.5) in training mode is stochastic; we
    # reproduce eval-mode semantics (identity) so the kernel is deterministic.
    o_ref[0] = out.astype(o_ref.dtype)


def model_forward(x1, x2, scaled_keys):
    """x1, x2: [B, H, S, D] float32; scaled_keys: [1, H, S, S] float32."""
    B, H, S, D = x1.shape
    assert x2.shape == (B, H, S, D)
    assert scaled_keys.shape == (1, H, S, S)

    return pl.pallas_call(
        _sdp_like_kernel,
        out_shape=jax.ShapeDtypeStruct((B, H, S, D), x1.dtype),
        grid=(B,),
        in_specs=[
            pl.BlockSpec((1, H, S, D), lambda b: (b, 0, 0, 0)),
            pl.BlockSpec((1, H, S, D), lambda b: (b, 0, 0, 0)),
            # key parameter has batch dim 1 -> constant block index, no re-DMA
            pl.BlockSpec((1, H, S, S), lambda b: (0, 0, 0, 0)),
        ],
        out_specs=pl.BlockSpec((1, H, S, D), lambda b: (b, 0, 0, 0)),
        compiler_params=pltpu.CompilerParams(
            dimension_semantics=("parallel",)),
    )(x1, x2, scaled_keys)


if __name__ == "__main__":
    # Small deterministic shapes consistent with the module:
    #   inputs x1, x2       : [B=2, H=4, S=16, D=16]
    #   key parameter       : [1, H=4, S=16, S=16]   (module used (1, 3, 64, 64))
    #   scale_factor        : scalar drawn from N(0, 1)
    B, H, S, D = 2, 4, 16, 16
    key0 = jax.random.PRNGKey(0)
    k1, k2, k3, k4 = jax.random.split(key0, 4)

    x1 = jax.random.normal(k1, (B, H, S, D), dtype=jnp.float32)
    x2 = jax.random.normal(k2, (B, H, S, D), dtype=jnp.float32)
    key_param = jax.random.normal(k3, (1, H, S, S), dtype=jnp.float32)
    scale_factor = jax.random.normal(k4, (1,), dtype=jnp.float32)

    # Module __init__ precomputes scaled_dot_product = key * scale_factor
    # (one-time glue op, kept outside the kernel / any hot loop).
    scaled_keys = key_param * scale_factor[0]

    out = model_forward(x1, x2, scaled_keys)
    out = jax.block_until_ready(out)

    # Pure-JAX reference check (eval-mode dropout == identity).
    qk_ref = jnp.einsum("bhsd,bhtd->bhst", x1, x2)
    v_ref = jnp.einsum("bhst,bhtd->bhsd", qk_ref, x2)
    ref = jnp.einsum("xhst,bhtd->bhsd", scaled_keys, v_ref)
    assert jnp.allclose(out, ref, atol=1e-3, rtol=1e-3), "mismatch vs reference"

    print("KERNEL_OK")
</pallas_src>

<mosaic_0001>
module attributes {stable_mosaic.version = 11 : i64} {
  func.func @_sdp_like_kernel(%arg0: i32, %arg1: memref<1x4x16x16xf32, #tpu.memory_space<vmem>>, %arg2: memref<1x4x16x16xf32, #tpu.memory_space<vmem>>, %arg3: memref<1x4x16x16xf32, #tpu.memory_space<vmem>>, %arg4: memref<1x4x16x16xf32, #tpu.memory_space<vmem>>) attributes {dimension_semantics = [#tpu.dimension_semantics<parallel>], iteration_bounds = array<i64: 2>, scalar_prefetch = 0 : i64, scratch_operands = 0 : i64, tpu.core_type = #tpu.core_type<tc>, window_params = [{transform_indices = @transform_0, window_bounds = array<i64: 1, 4, 16, 16>}, {transform_indices = @transform_1, window_bounds = array<i64: 1, 4, 16, 16>}, {pipeline_mode = #tpu.pipeline_mode<synchronous>, transform_indices = @transform_2, window_bounds = array<i64: 1, 4, 16, 16>}, {transform_indices = @transform_3, window_bounds = array<i64: 1, 4, 16, 16>}]} {
    %c0 = arith.constant 0 : index
    %c0_0 = arith.constant 0 : index
    %c0_1 = arith.constant 0 : index
    %c0_2 = arith.constant 0 : index
    %0 = vector.load %arg1[%c0, %c0_0, %c0_1, %c0_2] : memref<1x4x16x16xf32, #tpu.memory_space<vmem>>, vector<1x4x16x16xf32>
    %1 = vector.shape_cast %0 : vector<1x4x16x16xf32> to vector<4x16x16xf32>
    %c0_3 = arith.constant 0 : index
    %c0_4 = arith.constant 0 : index
    %c0_5 = arith.constant 0 : index
    %c0_6 = arith.constant 0 : index
    %2 = vector.load %arg2[%c0_3, %c0_4, %c0_5, %c0_6] : memref<1x4x16x16xf32, #tpu.memory_space<vmem>>, vector<1x4x16x16xf32>
    %3 = vector.shape_cast %2 : vector<1x4x16x16xf32> to vector<4x16x16xf32>
    %c0_7 = arith.constant 0 : index
    %c0_8 = arith.constant 0 : index
    %c0_9 = arith.constant 0 : index
    %c0_10 = arith.constant 0 : index
    %4 = vector.load %arg3[%c0_7, %c0_8, %c0_9, %c0_10] : memref<1x4x16x16xf32, #tpu.memory_space<vmem>>, vector<1x4x16x16xf32>
    %5 = vector.shape_cast %4 : vector<1x4x16x16xf32> to vector<4x16x16xf32>
    "tpu.trace_start"() <{level = 10 : i32, message = "hsd,htd->hst"}> : () -> ()
    %cst = arith.constant dense<0.000000e+00> : vector<4x16x16xf32>
    %6 = tpu.matmul %1, %3, %cst {dimension_numbers = #tpu.dot_dimension_numbers<[2], [2], [1], [1], [0, 0, 0, 1, 1, 1], [0], [0]>} : vector<4x16x16xf32>, vector<4x16x16xf32>, vector<4x16x16xf32> -> vector<4x16x16xf32>
    "tpu.trace_stop"() : () -> ()
    "tpu.trace_start"() <{level = 10 : i32, message = "hst,htd->hsd"}> : () -> ()
    %cst_11 = arith.constant dense<0.000000e+00> : vector<4x16x16xf32>
    %7 = tpu.matmul %6, %3, %cst_11 {dimension_numbers = #tpu.dot_dimension_numbers<[2], [1], [1], [2], [0, 0, 0, 1, 1, 2], [0], [0]>} : vector<4x16x16xf32>, vector<4x16x16xf32>, vector<4x16x16xf32> -> vector<4x16x16xf32>
    %cst_12 = arith.constant dense<0.000000e+00> : vector<4x16x16xf32>
    %8 = tpu.matmul %5, %7, %cst_12 {dimension_numbers = #tpu.dot_dimension_numbers<[2], [1], [1], [2], [0, 0, 0, 1, 1, 2], [0], [0]>} : vector<4x16x16xf32>, vector<4x16x16xf32>, vector<4x16x16xf32> -> vector<4x16x16xf32>
    "tpu.trace_stop"() : () -> ()
    %c0_13 = arith.constant 0 : index
    %c0_14 = arith.constant 0 : index
    %c0_15 = arith.constant 0 : index
    %c0_16 = arith.constant 0 : index
    %9 = vector.load %arg4[%c0_13, %c0_14, %c0_15, %c0_16] : memref<1x4x16x16xf32, #tpu.memory_space<vmem>>, vector<1x4x16x16xf32>
    %10 = vector.shape_cast %9 : vector<1x4x16x16xf32> to vector<4x16x16xf32>
    %11 = vector.shape_cast %8 : vector<4x16x16xf32> to vector<1x4x16x16xf32>
    tpu.vector_store %arg4[%c0_13, %c0_14, %c0_15, %c0_16], %11 {strides = array<i32>} : memref<1x4x16x16xf32, #tpu.memory_space<vmem>>, vector<1x4x16x16xf32>,
    return
  }
  func.func @transform_0(%arg0: i32) -> (i32, i32, i32, i32) {
    %c0_i32 = arith.constant 0 : i32
    %c0_i32_0 = arith.constant 0 : i32
    %c0_i32_1 = arith.constant 0 : i32
    %c0_i32_2 = arith.constant 0 : i32
    return %arg0, %c0_i32, %c0_i32_0, %c0_i32_1 : i32, i32, i32, i32
  }
  func.func @transform_1(%arg0: i32) -> (i32, i32, i32, i32) {
    %c0_i32 = arith.constant 0 : i32
    %c0_i32_0 = arith.constant 0 : i32
    %c0_i32_1 = arith.constant 0 : i32
    %c0_i32_2 = arith.constant 0 : i32
    return %arg0, %c0_i32, %c0_i32_0, %c0_i32_1 : i32, i32, i32, i32
  }
  func.func @transform_2(%arg0: i32) -> (i32, i32, i32, i32) {
    %c0_i32 = arith.constant 0 : i32
    %c0_i32_0 = arith.constant 0 : i32
    %c0_i32_1 = arith.constant 0 : i32
    %c0_i32_2 = arith.constant 0 : i32
    %c0_i32_3 = arith.constant 0 : i32
    return %c0_i32, %c0_i32_0, %c0_i32_1, %c0_i32_2 : i32, i32, i32, i32
  }
  func.func @transform_3(%arg0: i32) -> (i32, i32, i32, i32) {
    %c0_i32 = arith.constant 0 : i32
    %c0_i32_0 = arith.constant 0 : i32
    %c0_i32_1 = arith.constant 0 : i32
    %c0_i32_2 = arith.constant 0 : i32
    return %arg0, %c0_i32, %c0_i32_0, %c0_i32_1 : i32, i32, i32, i32
  }
}

</mosaic_0001>

<bundles_post_ra>
// kernel: tpu_custom_call.1
= control target key start
LH: loop header
LB: loop body
LE: loop exit
PB: predicated region body
PF: predicated region fallthrough
CT: control target
= control target key end

     0   :  { %s2122_s0 = inlined_call_operand.hbm [shape: f32[2,4,16,16], index: 0, kind: input, shape index: {}]   ;;  %s2123_s1 = inlined_call_operand.hbm [shape: f32[2,4,16,16], index: 1, kind: input, shape index: {}]   ;;  %s2124_s2 = inlined_call_operand.hbm [shape: f32[1,4,16,16], index: 2, kind: input, shape index: {}]   ;;  %s2125_s3 = inlined_call_operand.hbm [shape: f32[2,4,16,16], index: 3, kind: output, shape index: {}]  }
   0x1   :  { %2133 = sst [smem:[#allocation13_spill]] %s2122_s0 }
   0x2   :  { %2134 = sst [smem:[#allocation14_spill]] %s2124_s2 }
   0x3   :  { %8 = vsyncpa [#allocation3], 0 }
   0x4   :  { %10 = vsyncpa [#allocation3 + $0x1], 0 }
   0x5   :  { %11 = vsyncpa [#allocation6], 0 }
   0x6   :  { %13 = vsyncpa [#allocation6 + $0x1], 0 }
   0x7   :  { %14 = vsyncpa [#allocation4], 0 }
   0x8   :  { %16 = vsyncpa [#allocation4 + $0x1], 0  ;;  %s1828_s12 = smov 0   ;;  %s1830_s13 = smov 0  }
   0x9   :  { %s1832_s14 = smov 0   ;;  %s1834_s15 = smov 0  }
   0xa LB: > { %s1849_s16 = sadd.s32 4294967295, %s1798_s15   ;;  %s1391_s17 = sadd.s32 4294967294, %s1798_s15   ;;  %s1798_s15 = sphi %s1834_s15, %s2155_s15   ;;  %s1794_s14 = sphi %s1832_s14, %s2154_s14   ;;  %s1790_s13 = sphi %s1830_s13, %s2153_s13   ;;  %s1786_s12 = sphi %s1828_s12, %s2152_s12  }
   0xb   : > { %p42_p0 = scmp.ne.s32.totalorder %s1790_s13, %s1786_s12  ;;  %p2130_p1 = scmp.eq.s32.totalorder %s1849_s16, 0 }
   0xc   : > { %p119_p3 = scmp.eq.s32.totalorder %s1391_s17, 1  ;;  %p1392_p5 = scmp.ge.s32.totalorder %s1798_s15, 1 }
   0xd   : > { %p1858_p4 = por %p2130_p1, %p42_p0  ;;  %p126_p7 = scmp.lt.s32.totalorder %s1798_s15, 3 }
   0xe   : > { %p1863_p6 = por %p119_p3, %p42_p0  ;;  %s1800_s21 = smov [#allocation7]  }
   0xf   : > { %s2135_s18 = scalar_select %p1858_p4, 1, 0 }
  0x10   : > { %s2136_s19 = scalar_select %p1863_p6, 1, 0 }
  0x11   : > { %p1868_p8 = pnand %p1392_p5, %p126_p7  ;;  %s138_s22 = sshll.u32 %s1800_s21, 4  ;;  %s139_s22 = int_to_ptr.vmem [resolvable:$true] %s138_s22 }
  0x12   : > { %s1882_s24 = sadd.s32 1, %s1798_s15   ;;  %s29_s25 = sadd.s32 1, %s1794_s14 }
  0x13   : > { %p1588_p9 = pneg %p1868_p8  ;;  %s26_s26 = ssub.s32 %s1798_s15, %s1882_s24 }
  0x14   : > { %s1655_s27 = scalar_lea.vmem %s139_s22, 1024  ;;  %p1663_p5 = scmp.lt.s32.totalorder %s139_s22, %s139_s22 }
  0x15   : > { %p1877_p11 = pnand %p1588_p9, %p2130_p1  ;;  %p1656_p13 = scmp.ne.s32.totalorder %s139_s22, %s1655_s27 }
  0x16   : > { %p1664_p7 = scmp.lt.s32.totalorder %s1655_s27, %s1655_s27 }
  0x17   : > { %p1646_p12 = pneg %p1877_p11 }
  0x18   : > { %p1665_p10 = por %p1664_p7, %p1663_p5 }
  0x19   : > { %p1658_p0 = pnand %p1656_p13, %p1646_p12 }
  0x1b   : > { %p1659_p3 = pneg %p1658_p0 }
  0x1d   : > { %p1666_p2 = pnand %p1665_p10, %p1659_p3 }
  0x1f   : > { %1669 = shalt.err (!%p1666_p2)
}
  0x20   : > { %s2126_s28 = smov 128   ;;  %s2128_s29 = smov 8  }
  0x21   : > { %s2139_s2 = sld [smem:[#allocation14_spill]]  ;;  %p27_p2 = scmp.eq.s32.totalorder %s26_s26, 0 }
  0x22   : > { %p36_p9 = scmp.ne.s32.totalorder %s1794_s14, %s1790_s13  ;;  %p37_p10 = scmp.eq.s32.totalorder %s1798_s15, 0 }
  0x23   : > { %p1604_p12 = scmp.lt.s32.totalorder %s1798_s15, 2  ;;  %p2140_p0 = scmp.eq.s32.totalorder %s1849_s16, 1 }
  0x24   : > { %s1902_s5 = scalar_select %p27_p2, %s1794_s14, %s29_s25  }
  0x25   : > { %p38_p13 = por %p37_p10, %p36_p9  ;;  %p1906_p3 = por %p2140_p0, %p36_p9 }
  0x26   : > { %s152_s7 = sand.u32 1, %s1794_s14   ;;  %s1443_s8 = sshll.u32 %s1798_s15, 10 }
  0x27   : > { %1591 = dma.hbm_to_vmem [thread:$0]  (!%p1877_p11), %s2139_s2, 1024, %s139_s22, [#allocation6], %s2126_s28, %s2126_s28, %s2128_s29  }
  0x28   : > { %s2141_s6 = scalar_select %p1906_p3, 1, 0 }
  0x29   : > { %s1912_s9 = sshll.u32 %s152_s7, 6  ;;  %s2142_s0 = sld [smem:[#allocation13_spill]] }
  0x2a   : > { %s156_s21 = scalar_lea.vmem [#allocation2], %s1912_s9  ;;  %p1920_p11 = pnand %p1604_p12, %p38_p13 }
  0x2b   : > { %s163_s22 = sshll.u32 %s156_s21, 4  ;;  %s1929_s27 = scalar_lea.hbm %s2123_s1, %s1443_s8  ;;  %s1924_s22 = int_to_ptr.vmem [resolvable:$true] %s163_s22 }
  0x2c   : > { %s1931_s30 = scalar_lea.sflag [#allocation3], %s152_s7  ;;  %p1672_p7 = pneg %p1920_p11 }
  0x2f   : > { %s1917_s17 = scalar_lea.hbm %s2142_s0, %s1443_s8  ;;  %s1675_s21 = scalar_lea.hbm %s2142_s0, 2048 }
  0x30   : > { %s1670_s4 = scalar_lea.hbm %s1917_s17, 1024  ;;  %p1676_p10 = scmp.lt.s32.totalorder %s1917_s17, %s2142_s0 }
  0x31   : > { %p1671_p5 = scmp.ne.s32.totalorder %s1917_s17, %s1670_s4  ;;  %p1677_p12 = scmp.lt.s32.totalorder %s1675_s21, %s1670_s4 }
  0x33   : > { %p1673_p2 = pnand %p1672_p7, %p1671_p5  ;;  %p1678_p13 = por %p1677_p12, %p1676_p10 }
  0x35   : > { %p1674_p9 = pneg %p1673_p2 }
  0x37   : > { %p1679_p0 = pnand %p1678_p13, %p1674_p9 }
  0x39   : > { %1682 = shalt.err (!%p1679_p0)
}
  0x3a   : > { %s1683_s7 = scalar_lea.vmem %s1924_s22, 1024  ;;  %s1803_s8 = smov [#allocation2]  }
  0x3b   : > { %p1684_p1 = scmp.ne.s32.totalorder %s1924_s22, %s1683_s7  ;;  %s1688_s25 = sshll.u32 %s1803_s8, 4  ;;  %s1689_s25 = int_to_ptr.vmem [resolvable:$false] %s1688_s25 }
  0x3c   : > { %s1690_s26 = scalar_lea.vmem %s1689_s25, 2048  ;;  %p1691_p6 = scmp.lt.s32.totalorder %s1924_s22, %s1689_s25 }
  0x3d   : > { %p1686_p5 = pnand %p1684_p1, %p1672_p7  ;;  %p1692_p3 = scmp.lt.s32.totalorder %s1690_s26, %s1683_s7 }
  0x3f   : > { %p1687_p2 = pneg %p1686_p5  ;;  %p1693_p4 = por %p1692_p3, %p1691_p6 }
  0x41   : > { %p1694_p10 = pnand %p1693_p4, %p1687_p2 }
  0x43   : > { %1697 = shalt.err (!%p1694_p10)
}
  0x44   : > { %s2144_s28 = smov 8   ;;  %s2145_s29 = smov 128  }
  0x45   : > { %1595 = dma.hbm_to_vmem [thread:$0]  (!%p1920_p11), %s1917_s17, 1024, %s1924_s22, %s1931_s30, %s2145_s29, %s2145_s29, %s2144_s28  }
  0x46   : > { %s177_s4 = scalar_lea.vmem [#allocation5], %s1912_s9  ;;  %s173_s11 = sand.u32 1, %s1798_s15  }
  0x47   : > { %s184_s10 = sshll.u32 %s177_s4, 4  ;;  %s174_s21 = scalar_lea.sflag [#allocation6], %s173_s11  ;;  %s1963_s10 = int_to_ptr.vmem [resolvable:$true] %s184_s10 }
  0x48   : > { %s1698_s7 = scalar_lea.hbm %s1929_s27, 1024  ;;  %s1703_s26 = scalar_lea.hbm %s2123_s1, 2048 }
  0x49   : > { %p1699_p1 = scmp.ne.s32.totalorder %s1929_s27, %s1698_s7  ;;  %p1704_p3 = scmp.lt.s32.totalorder %s1929_s27, %s2123_s1 }
  0x4a   : > { %p1705_p9 = scmp.lt.s32.totalorder %s1703_s26, %s1698_s7 }
  0x4b   : > { %p1701_p4 = pnand %p1699_p1, %p1672_p7 }
  0x4c   : > { %p1706_p12 = por %p1705_p9, %p1704_p3 }
  0x4d   : > { %p1702_p6 = pneg %p1701_p4 }
  0x4f   : > { %p1707_p13 = pnand %p1706_p12, %p1702_p6 }
  0x51   : > { %1710 = shalt.err (!%p1707_p13)
}
  0x52   : > { %s1711_s9 = scalar_lea.vmem %s1963_s10, 1024  ;;  %s1804_s17 = smov [#allocation5]  }
  0x53   : > { %p1712_p0 = scmp.ne.s32.totalorder %s1963_s10, %s1711_s9  ;;  %s1716_s22 = sshll.u32 %s1804_s17, 4  ;;  %s1717_s22 = int_to_ptr.vmem [resolvable:$false] %s1716_s22 }
  0x54   : > { %s1718_s30 = scalar_lea.vmem %s1717_s22, 2048  ;;  %p1719_p10 = scmp.lt.s32.totalorder %s1963_s10, %s1717_s22 }
  0x55   : > { %p1714_p5 = pnand %p1712_p0, %p1672_p7  ;;  %p1720_p1 = scmp.lt.s32.totalorder %s1718_s30, %s1711_s9 }
  0x57   : > { %p1715_p2 = pneg %p1714_p5  ;;  %p1721_p4 = por %p1720_p1, %p1719_p10 }
  0x59   : > { %p1722_p3 = pnand %p1721_p4, %p1715_p2 }
  0x5b   : > { %1725 = shalt.err (!%p1722_p3)
}
  0x5c   : > { %1598 = dma.hbm_to_vmem [thread:$0]  (!%p1920_p11), %s1929_s27, 1024, %s1963_s10, %s174_s21, %s2145_s29, %s2145_s29, %s2144_s28  }
  0x5d   : > { %196 = sbr.rel (%p1868_p8) target bundleno = 724 (0x2d4), region = 32  ;;  %s1993_s0 = sand.u32 (!%p1868_p8), 1, %s1790_s13  }
  0x5e   : > { %s1996_s2 = sshll.u32 (!%p1868_p8), %s1993_s0, 6  ;;  %s199_s4 = scalar_lea.sflag (!%p1868_p8), [#allocation3], %s1993_s0 }
  0x5f   : > { %s2000_s23 = scalar_lea.vmem (!%p1868_p8), [#allocation2], %s1996_s2  ;;  %p2146_p7 = scmp.ne.s32.totalorder (!%p1868_p8), %s2135_s18, 0 }
  0x62   : > { %1769 = dma.done.wait (%p2146_p7), %s199_s4, 1024  }
  0x63   : > { %1771 = vsyncadd (%p2146_p7), %s199_s4, 4294966272  ;;  %s207_s20 = sand.u32 1, %s1849_s16   ;;  %s211_s28 = scalar_lea.vmem [#allocation5], %s1996_s2 }
  0x64   : > { %s208_s27 = scalar_lea.sflag [#allocation6], %s207_s20 }
  0x65   : > { %1773 = dma.done.wait (%p2146_p7), %s208_s27, 1024  }
  0x66   : > { %1775 = vsyncadd (%p2146_p7), %s208_s27, 4294966272  ;;  %p2147_p8 = scmp.eq.s32.totalorder %s1849_s16, 0 }
  0x68   : > { %1777 = dma.done.wait (%p2147_p8), [#allocation6], 1024   ;;  %p2148_p11 = pmov %p2147_p8 }
  0x69   : > { %vm267_vm0 = vcmask 130048   ;;  %v252_v0 = vld [vmem:[%s211_s28 + $0x8] sm:$0xff]  ;;  %v254_v1 = vld [vmem:[%s211_s28 + $0x18] sm:$0xff]  ;;  %v251_v2 = vld [vmem:[%s211_s28] sm:$0xff]  ;;  %s242_s18 = scalar_lea.vmem [#allocation8], %s1996_s2  ;;  %s1445_s10 = sshll.u32 %s1849_s16, 10 }
  0x6a   : > { %1779 = vsyncadd (%p2148_p11), [#allocation6], 4294966272  ;;  %1494 = vmatprep.subr.msk.mxu0 %vm267_vm0, %v252_v0  ;;  %1501 = vmatprep.subr.msk.mxu1 %vm267_vm0, %v254_v1  ;;  %v253_v3 = vld [vmem:[%s211_s28 + $0x10] sm:$0xff]  ;;  %v243_v4 = vld [vmem:[%s2000_s23] sm:$0xff]  ;;  %s1286_s29 = sshll.u32 %s242_s18, 4  ;;  %s2075_s7 = scalar_lea.hbm %s2125_s3, %s1445_s10  ;;  %s2070_s29 = int_to_ptr.vmem [resolvable:$true] %s1286_s29 }
  0x6b   : > { %v245_v5 = vld [vmem:[%s2000_s23 + $0x10] sm:$0xff]  ;;  %1495 = vmatpush3.xpose.msk.msra.mxu0 %vm267_vm0, %v252_v0  ;;  %1502 = vmatpush3.xpose.msk.msra.mxu1 %vm267_vm0, %v254_v1  ;;  %v256_v6 = vld [vmem:[%s211_s28 + $0x28] sm:$0xff]  ;;  %v258_v7 = vld [vmem:[%s211_s28 + $0x38] sm:$0xff]  ;;  %s1273_s16 = scalar_lea.sflag [#allocation4], %s1993_s0  ;;  %s1726_s8 = scalar_lea.vmem %s2070_s29, 1024 }
  0x6c   : > { %1496 = vmatprep.subr.msk.mxu0 %vm267_vm0, %v251_v2  ;;  %1503 = vmatprep.subr.msk.mxu1 %vm267_vm0, %v253_v3  ;;  %v244_v8 = vld [vmem:[%s2000_s23 + $0x8] sm:$0xff]  ;;  %v246_v9 = vld [vmem:[%s2000_s23 + $0x18] sm:$0xff]  ;;  %v255_v10 = vld [vmem:[%s211_s28 + $0x20] sm:$0xff]  ;;  %p1727_p6 = scmp.ne.s32.totalorder %s2070_s29, %s1726_s8  ;;  %p2149_p9 = scmp.ne.s32.totalorder %s2141_s6, 0 }
  0x6d   : > { %1498 = vmatprep.mubr.msk.f32.mxu0 %vm267_vm0, %v243_v4  ;;  %1505 = vmatprep.mubr.msk.f32.mxu1 %vm267_vm0, %v245_v5  ;;  %v257_v11 = vld [vmem:[%s211_s28 + $0x30] sm:$0xff]  ;;  %v247_v12 = vld [vmem:[%s2000_s23 + $0x20] sm:$0xff]  ;;  %v248_v14 = vld [vmem:[%s2000_s23 + $0x28] sm:$0xff]  ;;  %s1805_s25 = smov [#allocation8]  }
  0x6e   : > { %v249_v13 = vld [vmem:[%s2000_s23 + $0x30] sm:$0xff]  ;;  %v250_v15 = vld [vmem:[%s2000_s23 + $0x38] sm:$0xff]  ;;  %v259_v24 = vld [vmem:[#allocation7] sm:$0xff]  ;;  %p1728_p12 = pnand %p1727_p6, %p2149_p9  ;;  %s1730_s26 = sshll.u32 %s1805_s25, 4  ;;  %s1731_s26 = int_to_ptr.vmem [resolvable:$false] %s1730_s26 }
  0x6f   : > { %1497 = vmatpush3.xpose.msk.msra.mxu0 %vm267_vm0, %v251_v2  ;;  %1504 = vmatpush3.xpose.msk.msra.mxu1 %vm267_vm0, %v253_v3  ;;  %v261_v25 = vld [vmem:[#allocation7 + $0x10] sm:$0xff]  ;;  %v260_v30 = vld [vmem:[#allocation7 + $0x8] sm:$0xff]  ;;  %v262_v31 = vld [vmem:[#allocation7 + $0x18] sm:$0xff]  ;;  %s1732_s9 = scalar_lea.vmem %s1731_s26, 2048  ;;  %p1733_p0 = scmp.lt.s32.totalorder %s2070_s29, %s1731_s26 }
  0x70   : > { %1508 = vmatprep.subr.msk.mxu0 %vm267_vm0, %v256_v6  ;;  %1515 = vmatprep.subr.msk.mxu1 %vm267_vm0, %v258_v7  ;;  %v263_v32 = vld [vmem:[#allocation7 + $0x20] sm:$0xff]  ;;  %v265_v33 = vld [vmem:[#allocation7 + $0x30] sm:$0xff]  ;;  %v264_v38 = vld [vmem:[#allocation7 + $0x28] sm:$0xff]  ;;  %p1729_p13 = pneg %p1728_p12  ;;  %p1734_p5 = scmp.lt.s32.totalorder %s1732_s9, %s1726_s8 }
  0x71   : > { %v266_v39 = vld [vmem:[#allocation7 + $0x38] sm:$0xff] }
  0x72   : > { %1499 = vmatmul.mubr.msk.f32.vlgmr.msra.gmra.mxu0 %vm267_vm0, %v244_v8  ;;  %1506 = vmatmul.mubr.msk.f32.vlgmr.msra.gmra.mxu1 %vm267_vm0, %v246_v9  ;;  %p1735_p2 = por %p1734_p5, %p1733_p0 }
  0x73   : > { %1509 = vmatpush3.xpose.msk.msra.mxu0 %vm267_vm0, %v256_v6  ;;  %1516 = vmatpush3.xpose.msk.msra.mxu1 %vm267_vm0, %v258_v7 }
  0x74   : > { %1510 = vmatprep.subr.msk.mxu0 %vm267_vm0, %v255_v10  ;;  %1517 = vmatprep.subr.msk.mxu1 %vm267_vm0, %v257_v11  ;;  %p1736_p10 = pnand %p1735_p2, %p1729_p13 }
  0x75   : > { %1512 = vmatprep.mubr.msk.f32.mxu0 %vm267_vm0, %v247_v12  ;;  %1519 = vmatprep.mubr.msk.f32.mxu1 %vm267_vm0, %v249_v13 }
  0x77   : > { %1511 = vmatpush3.xpose.msk.msra.mxu0 %vm267_vm0, %v255_v10  ;;  %1518 = vmatpush3.xpose.msk.msra.mxu1 %vm267_vm0, %v257_v11 }
  0x78   : > { %1522 = vmatprep.subr.mxu0 %v252_v0  ;;  %1529 = vmatprep.subr.mxu1 %v254_v1 }
  0x7a   : > { %1513 = vmatmul.mubr.msk.f32.vlgmr.msra.gmra.mxu0 %vm267_vm0, %v248_v14  ;;  %1520 = vmatmul.mubr.msk.f32.vlgmr.msra.gmra.mxu1 %vm267_vm0, %v250_v15 }
  0x7b   : > { %1523 = vmatpush3.msra.mxu0 %v252_v0  ;;  %1530 = vmatpush3.msra.mxu1 %v254_v1 }
  0x7c   : > { %1524 = vmatprep.subr.mxu0 %v251_v2  ;;  %1531 = vmatprep.subr.mxu1 %v253_v3 }
  0x7d   : > { %1525 = vmatpush3.msra.mxu0 %v251_v2  ;;  %1532 = vmatpush3.msra.mxu1 %v253_v3 }
  0x7e   : > { %1536 = vmatprep.subr.mxu0 %v256_v6  ;;  %1543 = vmatprep.subr.mxu1 %v258_v7 }
 0x132   : > { %v1500_v16 = vpop.f32.mrf.mxu0  ;;  %v1507_v17 = vpop.f32.mrf.mxu1 }
 0x134   : > { %v346_v18 = vpop.f32.mrf.mxu0  ;;  %v433_v19 = vpop.f32.mrf.mxu1 }
 0x135   : > { %1526 = vmatprep.mubr.msk.f32.mxu0 %vm267_vm0, %v346_v18  ;;  %1533 = vmatprep.mubr.msk.f32.mxu1 %vm267_vm0, %v433_v19 }
 0x136   : > { %1527 = vmatmul.mubr.msk.f32.vlgmr.msra.gmra.mxu0 %vm267_vm0, %v1500_v16  ;;  %1534 = vmatmul.mubr.msk.f32.vlgmr.msra.gmra.mxu1 %vm267_vm0, %v1507_v17 }
 0x137   : > { %1537 = vmatpush3.msra.mxu0 %v256_v6  ;;  %1544 = vmatpush3.msra.mxu1 %v258_v7 }
 0x138   : > { %1538 = vmatprep.subr.mxu0 %v255_v10  ;;  %1545 = vmatprep.subr.mxu1 %v257_v11 }
 0x139   : > { %1539 = vmatpush3.msra.mxu0 %v255_v10  ;;  %1546 = vmatpush3.msra.mxu1 %v257_v11 }
 0x13a   : > { %v1514_v20 = vpop.f32.mrf.mxu0  ;;  %v1521_v21 = vpop.f32.mrf.mxu1 }
 0x13c   : > { %v520_v22 = vpop.f32.mrf.mxu0  ;;  %v607_v23 = vpop.f32.mrf.mxu1 }
 0x13d   : > { %1540 = vmatprep.mubr.msk.f32.mxu0 %vm267_vm0, %v520_v22  ;;  %1547 = vmatprep.mubr.msk.f32.mxu1 %vm267_vm0, %v607_v23 }
 0x13e   : > { %1541 = vmatmul.mubr.msk.f32.vlgmr.msra.gmra.mxu0 %vm267_vm0, %v1514_v20  ;;  %1548 = vmatmul.mubr.msk.f32.vlgmr.msra.gmra.mxu1 %vm267_vm0, %v1521_v21 }
 0x13f   : > { %1554 = vmatprep.mubr.msk.f32.mxu0 %vm267_vm0, %v259_v24  ;;  %1561 = vmatprep.mubr.msk.f32.mxu1 %vm267_vm0, %v261_v25 }
 0x1f6   : > { %v1528_v26 = vpop.f32.mrf.mxu0  ;;  %v1535_v27 = vpop.f32.mrf.mxu1 }
 0x1f7   : > { %1550 = vmatprep.subr.mxu0 %v1528_v26  ;;  %1557 = vmatprep.subr.mxu1 %v1535_v27 }
 0x1f8   : > { %v688_v28 = vpop.f32.mrf.mxu0  ;;  %v769_v29 = vpop.f32.mrf.mxu1  ;;  %1551 = vmatpush3.msra.mxu0 %v1528_v26  ;;  %1558 = vmatpush3.msra.mxu1 %v1535_v27 }
 0x1f9   : > { %1552 = vmatprep.subr.mxu0 %v688_v28  ;;  %1559 = vmatprep.subr.mxu1 %v769_v29 }
 0x1fa   : > { %1553 = vmatpush3.msra.mxu0 %v688_v28  ;;  %1560 = vmatpush3.msra.mxu1 %v769_v29 }
 0x1fb   : > { %1555 = vmatmul.mubr.msk.f32.vlgmr.msra.gmra.mxu0 %vm267_vm0, %v260_v30  ;;  %1562 = vmatmul.mubr.msk.f32.vlgmr.msra.gmra.mxu1 %vm267_vm0, %v262_v31 }
 0x1fc   : > { %1568 = vmatprep.mubr.msk.f32.mxu0 %vm267_vm0, %v263_v32  ;;  %1575 = vmatprep.mubr.msk.f32.mxu1 %vm267_vm0, %v265_v33 }
 0x1fe   : > { %v1542_v34 = vpop.f32.mrf.mxu0  ;;  %v1549_v35 = vpop.f32.mrf.mxu1 }
 0x1ff   : > { %1564 = vmatprep.subr.mxu0 %v1542_v34  ;;  %1571 = vmatprep.subr.mxu1 %v1549_v35 }
 0x200   : > { %v850_v36 = vpop.f32.mrf.mxu0  ;;  %v931_v37 = vpop.f32.mrf.mxu1  ;;  %1565 = vmatpush3.msra.mxu0 %v1542_v34  ;;  %1572 = vmatpush3.msra.mxu1 %v1549_v35 }
 0x201   : > { %1566 = vmatprep.subr.mxu0 %v850_v36  ;;  %1573 = vmatprep.subr.mxu1 %v931_v37 }
 0x202   : > { %1567 = vmatpush3.msra.mxu0 %v850_v36  ;;  %1574 = vmatpush3.msra.mxu1 %v931_v37 }
 0x203   : > { %1569 = vmatmul.mubr.msk.f32.vlgmr.msra.gmra.mxu0 %vm267_vm0, %v264_v38  ;;  %1576 = vmatmul.mubr.msk.f32.vlgmr.msra.gmra.mxu1 %vm267_vm0, %v266_v39 }
 0x2bb   : > { %v1556_v40 = vpop.f32.mrf.mxu0  ;;  %v1563_v41 = vpop.f32.mrf.mxu1 }
 0x2bc   : > { %1265 = vst.msk [vmem:[%s242_s18 + $0x8] sm:$0xff] %vm267_vm0, %v1556_v40  ;;  %1267 = vst.msk [vmem:[%s242_s18 + $0x18] sm:$0xff] %vm267_vm0, %v1563_v41 }
 0x2bd   : > { %v1012_v42 = vpop.f32.mrf.mxu0  ;;  %v1093_v43 = vpop.f32.mrf.mxu1 }
 0x2be   : > { %1264 = vst.msk [vmem:[%s242_s18] sm:$0xff] %vm267_vm0, %v1012_v42  ;;  %1266 = vst.msk [vmem:[%s242_s18 + $0x10] sm:$0xff] %vm267_vm0, %v1093_v43 }
 0x2c3   : > { %v1570_v44 = vpop.f32.mrf.mxu0  ;;  %v1577_v45 = vpop.f32.mrf.mxu1 }
 0x2c4   : > { %1269 = vst.msk [vmem:[%s242_s18 + $0x28] sm:$0xff] %vm267_vm0, %v1570_v44  ;;  %1271 = vst.msk [vmem:[%s242_s18 + $0x38] sm:$0xff] %vm267_vm0, %v1577_v45 }
 0x2c5   : > { %v1174_v46 = vpop.f32.mrf.mxu0  ;;  %v1255_v47 = vpop.f32.mrf.mxu1 }
 0x2c6   : > { %1268 = vst.msk [vmem:[%s242_s18 + $0x20] sm:$0xff] %vm267_vm0, %v1174_v46  ;;  %1270 = vst.msk [vmem:[%s242_s18 + $0x30] sm:$0xff] %vm267_vm0, %v1255_v47 }
 0x2c7   : > { %1739 = shalt.err (!%p1736_p10)
}
 0x2c8   : > { %s1740_s17 = scalar_lea.hbm %s2075_s7, 1024  ;;  %s1744_s2 = scalar_lea.hbm %s2125_s3, 2048 }
 0x2c9   : > { %p1741_p1 = scmp.ne.s32.totalorder %s2075_s7, %s1740_s17  ;;  %p1745_p7 = scmp.lt.s32.totalorder %s2075_s7, %s2125_s3 }
 0x2ca   : > { %p1746_p8 = scmp.lt.s32.totalorder %s1744_s2, %s1740_s17 }
 0x2cb   : > { %p1742_p4 = pnand %p1741_p1, %p2149_p9 }
 0x2cc   : > { %p1747_p11 = por %p1746_p8, %p1745_p7 }
 0x2cd   : > { %p1743_p3 = pneg %p1742_p4 }
 0x2cf   : > { %p1748_p6 = pnand %p1747_p11, %p1743_p3 }
 0x2d1   : > { %1751 = shalt.err (!%p1748_p6)
}
 0x2d2   : > { %s1806_s20 = smov 128   ;;  %s1807_s27 = smov 8  }
 0x2d3   : > { %1586 = dma.vmem_to_hbm [thread:$0]  (%p2149_p9), %s2070_s29, 1024, %s2075_s7, %s1273_s16, %s1806_s20, %s1806_s20, %s1807_s27  }
 0x2d4 PF: > { %s1301_s28 = sand.u32 1, %s1786_s12   ;;  %p2150_p12 = scmp.ne.s32.totalorder %s2136_s19, 0 }
 0x2d5   : > { %p2151_p13 = scmp.ge.s32.totalorder %s1798_s15, 2  ;;  %s1302_s18 = scalar_lea.sflag [#allocation4], %s1301_s28 }
 0x2d7   : > { %p1600_p0 = pnand %p2151_p13, %p2150_p12 }
 0x2d9   : > { %p1601_p5 = pneg %p1600_p0 }
 0x2db   : > { %1781 = dma.done.wait (%p1601_p5), %s1302_s18, 1024  }
 0x2dc   : > { %1783 = vsyncadd (%p1601_p5), %s1302_s18, 4294966272  ;;  %p19_p2 = scmp.ge.s32.totalorder %s1882_s24, 4   ;;  %s2152_s12 = smov %s1790_s13 }
 0x2dd   : > { %s2153_s13 = smov %s1794_s14  ;;  %s2154_s14 = smov %s1902_s5 }
 0x2de   : > { %s2155_s15 = smov %s1882_s24  ;;  %21 = sbr.rel (!%p19_p2) target bundleno = 10 (0xa), region = 94 }
 0x2e3   :  { %1307 = vsyncpa [#allocation3], 1 }
 0x2e4   :  { %1309 = vsyncpa [#allocation3 + $0x1], 1 }
 0x2e5   :  { %1310 = vsyncpa [#allocation6], 1 }
 0x2e6   :  { %1312 = vsyncpa [#allocation6 + $0x1], 1 }
 0x2e7   :  { %1313 = vsyncpa [#allocation4], 1 }
 0x2e8   :  { %1315 = vsyncpa [#allocation4 + $0x1], 1 }

</bundles_post_ra>
